<compile_context>
chip_gen: v7x
topology: tpu7x:2x2x1
jax: 0.10.0
libtpu: 0.0.40
codegen_flags: <defaults>
</compile_context>

<pallas_src>
import functools
import math

import jax
import jax.numpy as jnp
from jax.experimental import pallas as pl
from jax.experimental.pallas import tpu as pltpu


LN_EPS = 1e-5
LANE = 128  # single lane-tile design; requires feature_dim, hidden_dim, 2*A <= 128


def _actor_kernel(obs_ref, w_ref, v_ref, out_ref, *,
                  r0, feature_dim, action_dim, min_std):
    """r0: row count of the trunk weight block inside the packed weight buffer.
    Weight pack rows: [0,r0) trunk W, [r0,r0+128) W1, [+128) W2, [+128) W3.
    Vector pack rows: 0 trunk bias, 1 LN gamma (zero-padded), 2 LN beta,
                      3 b1, 4 b2, 5 b3."""
    lane = w_ref.shape[-1]
    r1 = r0 + lane
    r2 = r1 + lane
    r3 = r2 + lane

    obs = obs_ref[...].astype(jnp.bfloat16)
    if obs.shape[-1] < r0:
        # K-pad in-register to the 16-aligned packed-weight row count; avoids a
        # wrapper-side XLA pad that would re-read/write obs in HBM.
        obs = jnp.pad(obs, ((0, 0), (0, r0 - obs.shape[-1])))

    # ---- trunk: Linear -> LayerNorm -> Tanh ----
    # Weight/bias lanes >= F are zero-padded, so h is exactly 0 there.
    h = jnp.dot(obs, w_ref[0:r0, :], preferred_element_type=jnp.float32) + v_ref[0:1, :]
    inv_f = 1.0 / float(feature_dim)
    mean = jnp.sum(h, axis=-1, keepdims=True) * inv_f
    fcol = jax.lax.broadcasted_iota(jnp.int32, h.shape, 1)
    d = jnp.where(fcol < feature_dim, h - mean, 0.0)      # mask padded lanes
    var = jnp.sum(d * d, axis=-1, keepdims=True) * inv_f  # centered two-pass var
    hn = d * jax.lax.rsqrt(var + LN_EPS)
    # gamma/beta are zero beyond F -> padded lanes stay tanh(0) = 0
    h = jnp.tanh(hn * v_ref[1:2, :] + v_ref[2:3, :])

    # ---- policy MLP: Linear -> ReLU -> Linear -> ReLU -> Linear ----
    x = jnp.dot(h.astype(jnp.bfloat16), w_ref[r0:r1, :],
                preferred_element_type=jnp.float32) + v_ref[3:4, :]
    x = jnp.maximum(x, 0.0)
    x = jnp.dot(x.astype(jnp.bfloat16), w_ref[r1:r2, :],
                preferred_element_type=jnp.float32) + v_ref[4:5, :]
    x = jnp.maximum(x, 0.0)
    z = jnp.dot(x.astype(jnp.bfloat16), w_ref[r2:r3, :],
                preferred_element_type=jnp.float32) + v_ref[5:6, :]

    # ---- fused head activation: ONE sigmoid pass through the EUP ----
    # lanes [0, A) : mu  = tanh(z)  = 2*sigmoid(2z) - 1
    # lanes [A,2A) : std = sigmoid(z) + min_std
    col = jax.lax.broadcasted_iota(jnp.int32, z.shape, 1)
    is_mu = col < action_dim
    s = jax.nn.sigmoid(jnp.where(is_mu, 2.0 * z, z))
    res = jnp.where(is_mu, 2.0 * s - 1.0, s + min_std)

    # Narrow (TB, 2A) store: only useful lanes hit HBM.
    out_ref[...] = res[:, :out_ref.shape[-1]]


def _pick_batch_tile(B):
    """Batch tile: one block for small batches; 512-1024-row tiles for large
    batches while keeping >= 2 grid steps (so the "parallel" axis shards across
    v7x's two TensorCores)."""
    if B <= 256:
        return B                                   # full-dim block is always legal
    half = (((B + 1) // 2) + 7) // 8 * 8           # ~B/2, 8-row aligned
    return min(1024, half)


@functools.partial(jax.jit, static_argnames=("feature_dim", "action_dim", "min_std"))
def actor_forward(obs, w_pack, v_pack, *, feature_dim, action_dim, min_std=0.1):
    """Returns (mu, std) of shape (B, action_dim) each.

    obs may be f32 or bf16 (a bf16 producer halves the obs input DMA bytes).

    TODO(synk): utils.TruncatedNormal(mu, std) (the distribution object /
    sampling) has no Pallas equivalent; the kernel returns its parameters.
    """
    B = obs.shape[0]
    lane = w_pack.shape[-1]
    r0 = w_pack.shape[0] - 3 * lane                # padded repr_dim rows
    assert obs.shape[1] <= r0, "obs feature dim exceeds packed trunk weight rows"

    TB = _pick_batch_tile(B)
    grid = (pl.cdiv(B, TB),)                       # partial last tile is masked

    kernel = functools.partial(_actor_kernel, r0=r0, feature_dim=feature_dim,
                               action_dim=action_dim, min_std=min_std)

    out = pl.pallas_call(
        kernel,
        out_shape=jax.ShapeDtypeStruct((B, 2 * action_dim), jnp.float32),
        grid=grid,
        in_specs=[
            pl.BlockSpec((TB, obs.shape[1]), lambda i: (i, 0)),   # obs tile
            pl.BlockSpec(w_pack.shape, lambda i: (0, 0)),         # weights (resident)
            pl.BlockSpec(v_pack.shape, lambda i: (0, 0)),         # biases/LN (resident)
        ],
        out_specs=pl.BlockSpec((TB, 2 * action_dim), lambda i: (i, 0)),
        compiler_params=pltpu.CompilerParams(
            dimension_semantics=("parallel",)),
    )(obs, w_pack, v_pack)

    mu = out[:, :action_dim]
    std = out[:, action_dim:]
    return mu, std


# --------------------------------------------------------------------------- #
# Parameter construction / packing
# --------------------------------------------------------------------------- #
def init_params(key, repr_dim, action_dim, feature_dim, hidden_dim):
    """Natural-shape f32 parameters. Weights stored [in, out] (transposed vs
    torch) so the forward is x @ W + b."""
    ks = jax.random.split(key, 10)

    def dense(kw, kb, fan_in, fan_out):
        s = 1.0 / math.sqrt(fan_in)
        w = jax.random.uniform(kw, (fan_in, fan_out), jnp.float32, -s, s)
        b = jax.random.uniform(kb, (fan_out,), jnp.float32, -s, s)
        return w, b

    F, H, A2 = feature_dim, hidden_dim, 2 * action_dim
    wt, bt = dense(ks[0], ks[1], repr_dim, F)
    w1, b1 = dense(ks[2], ks[3], F, H)
    w2, b2 = dense(ks[4], ks[5], H, H)
    w3, b3 = dense(ks[6], ks[7], H, A2)
    gamma = 1.0 + 0.1 * jax.random.normal(ks[8], (F,), jnp.float32)
    beta = 0.1 * jax.random.normal(ks[9], (F,), jnp.float32)
    return [wt, bt, gamma, beta, w1, b1, w2, b2, w3, b3]


def pack_params(params, repr_dim, feature_dim, hidden_dim, action_dim):
    """Pack all weights into one bf16 [R0+3*128, 128] buffer (zero padded, all
    block offsets 16-row aligned) and all vectors into one f32 [8, 128] buffer."""
    wt, bt, gamma, beta, w1, b1, w2, b2, w3, b3 = params
    assert max(feature_dim, hidden_dim, 2 * action_dim) <= LANE, \
        "single-lane-tile packing requires feature/hidden/2*action <= 128"
    r0 = ((repr_dim + 15) // 16) * 16  # bf16 sublane-tile aligned block size

    def pad2(a, rows, cols):
        return jnp.pad(a, ((0, rows - a.shape[0]), (0, cols - a.shape[1])))

    w_pack = jnp.concatenate([
        pad2(wt, r0, LANE),     # rows [0, r0)
        pad2(w1, LANE, LANE),   # rows [r0, r0+128)
        pad2(w2, LANE, LANE),   # rows [r0+128, r0+256)
        pad2(w3, LANE, LANE),   # rows [r0+256, r0+384)
    ], axis=0).astype(jnp.bfloat16)

    def pad1(v):
        return jnp.pad(v, (0, LANE - v.shape[0]))

    zeros = jnp.zeros((LANE,), jnp.float32)
    v_pack = jnp.stack([pad1(bt), pad1(gamma), pad1(beta),
                        pad1(b1), pad1(b2), pad1(b3), zeros, zeros]).astype(jnp.float32)
    return w_pack, v_pack


# --------------------------------------------------------------------------- #
# Pure-JAX reference
# --------------------------------------------------------------------------- #
def reference_forward(obs, params, matmul_dtype=jnp.float32, min_std=0.1):
    wt, bt, gamma, beta, w1, b1, w2, b2, w3, b3 = params

    def dot(a, b):
        return jnp.dot(a.astype(matmul_dtype), b.astype(matmul_dtype),
                       preferred_element_type=jnp.float32)

    h = dot(obs, wt) + bt
    mean = jnp.mean(h, -1, keepdims=True)
    var = jnp.mean((h - mean) ** 2, -1, keepdims=True)
    h = jnp.tanh((h - mean) * jax.lax.rsqrt(var + LN_EPS) * gamma + beta)
    x = jnp.maximum(dot(h, w1) + b1, 0.0)
    x = jnp.maximum(dot(x, w2) + b2, 0.0)
    z = dot(x, w3) + b3
    mu, std = jnp.split(z, 2, axis=-1)
    return jnp.tanh(mu), jax.nn.sigmoid(std) + min_std


if __name__ == "__main__":
    REPR_DIM, ACTION_DIM, FEATURE_DIM, HIDDEN_DIM = 64, 6, 32, 64
    MIN_STD = 0.1

    key = jax.random.PRNGKey(0)
    k_obs, k_par, k_big = jax.random.split(key, 3)
    params = init_params(k_par, REPR_DIM, ACTION_DIM, FEATURE_DIM, HIDDEN_DIM)
    w_pack, v_pack = pack_params(params, REPR_DIM, FEATURE_DIM, HIDDEN_DIM, ACTION_DIM)

    # --- small-batch case (single grid step) ---
    B = 8
    obs = jax.random.normal(k_obs, (B, REPR_DIM), jnp.float32)
    mu, std = actor_forward(obs, w_pack, v_pack,
                            feature_dim=FEATURE_DIM, action_dim=ACTION_DIM,
                            min_std=MIN_STD)
    jax.block_until_ready((mu, std))

    # Tight check against a reference with matching (bf16-operand) matmul precision.
    mu_m, std_m = reference_forward(obs, params, matmul_dtype=jnp.bfloat16, min_std=MIN_STD)
    # Loose check against the pure-f32 module semantics.
    mu_f, std_f = reference_forward(obs, params, matmul_dtype=jnp.float32, min_std=MIN_STD)

    assert mu.shape == (B, ACTION_DIM) and std.shape == (B, ACTION_DIM)
    assert jnp.allclose(mu, mu_m, atol=2e-3, rtol=2e-3)
    assert jnp.allclose(std, std_m, atol=2e-3, rtol=2e-3)
    assert jnp.allclose(mu, mu_f, atol=1e-1, rtol=1e-1)
    assert jnp.allclose(std, std_f, atol=1e-1, rtol=1e-1)
    assert bool(jnp.all(std > MIN_STD))  # sigmoid(.) + min_std floor

    # --- larger batch exercising multi-step grid + masked partial last tile ---
    B2 = 600  # -> TB=304, grid=(2,), last tile 296 rows (masked)
    obs2 = jax.random.normal(k_big, (B2, REPR_DIM), jnp.float32)
    mu2, std2 = actor_forward(obs2, w_pack, v_pack,
                              feature_dim=FEATURE_DIM, action_dim=ACTION_DIM,
                              min_std=MIN_STD)
    jax.block_until_ready((mu2, std2))
    mu2_m, std2_m = reference_forward(obs2, params, matmul_dtype=jnp.bfloat16,
                                      min_std=MIN_STD)
    assert mu2.shape == (B2, ACTION_DIM) and std2.shape == (B2, ACTION_DIM)
    assert jnp.allclose(mu2, mu2_m, atol=2e-3, rtol=2e-3)
    assert jnp.allclose(std2, std2_m, atol=2e-3, rtol=2e-3)
    assert bool(jnp.all(std2 > MIN_STD))

    print("KERNEL_OK")
</pallas_src>

<mosaic_0001>
module attributes {stable_mosaic.version = 11 : i64} {
  func.func @_actor_kernel(%arg0: i32, %arg1: memref<8x64xf32, #tpu.memory_space<vmem>>, %arg2: memref<448x128xbf16, #tpu.memory_space<vmem>>, %arg3: memref<8x128xf32, #tpu.memory_space<vmem>>, %arg4: memref<8x12xf32, #tpu.memory_space<vmem>>) attributes {dimension_semantics = [#tpu.dimension_semantics<parallel>], iteration_bounds = array<i64: 1>, scalar_prefetch = 0 : i64, scratch_operands = 0 : i64, tpu.core_type = #tpu.core_type<tc>, window_params = [{transform_indices = @transform_0, window_bounds = array<i64: 8, 64>}, {pipeline_mode = #tpu.pipeline_mode<synchronous>, transform_indices = @transform_1, window_bounds = array<i64: 448, 128>}, {pipeline_mode = #tpu.pipeline_mode<synchronous>, transform_indices = @transform_2, window_bounds = array<i64: 8, 128>}, {transform_indices = @transform_3, window_bounds = array<i64: 8, 12>}]} {
    %c0 = arith.constant 0 : index
    %c0_0 = arith.constant 0 : index
    %0 = vector.load %arg1[%c0, %c0_0] : memref<8x64xf32, #tpu.memory_space<vmem>>, vector<8x64xf32>
    %1 = arith.truncf %0 : vector<8x64xf32> to vector<8x64xbf16>
    %c0_1 = arith.constant 0 : index
    %c0_2 = arith.constant 0 : index
    %2 = vector.load %arg2[%c0_1, %c0_2] : memref<448x128xbf16, #tpu.memory_space<vmem>>, vector<64x128xbf16>
    %cst = arith.constant dense<0.000000e+00> : vector<8x128xf32>
    %3 = tpu.matmul %1, %2, %cst {dimension_numbers = #tpu.dot_dimension_numbers<[1], [0], [0], [1], [0, 0, 1, 1], [], []>} : vector<8x64xbf16>, vector<64x128xbf16>, vector<8x128xf32> -> vector<8x128xf32>
    %c0_3 = arith.constant 0 : index
    %c0_4 = arith.constant 0 : index
    %4 = vector.load %arg3[%c0_3, %c0_4] : memref<8x128xf32, #tpu.memory_space<vmem>>, vector<1x128xf32>
    %5 = vector.broadcast %4 : vector<1x128xf32> to vector<8x128xf32>
    %6 = arith.addf %3, %5 : vector<8x128xf32>
    %cst_5 = arith.constant dense<0.000000e+00> : vector<8xf32>
    %7 = vector.multi_reduction <add>, %6, %cst_5 [1] : vector<8x128xf32> to vector<8xf32>
    %8 = vector.shape_cast %7 : vector<8xf32> to vector<8x1xf32>
    %cst_6 = arith.constant 3.125000e-02 : f32
    %9 = vector.broadcast %cst_6 : f32 to vector<8x1xf32>
    %10 = arith.mulf %8, %9 : vector<8x1xf32>
    %11 = tpu.iota {dimensions = array<i32: 1>} : vector<8x128xi32>
    %c32_i32 = arith.constant 32 : i32
    %12 = vector.broadcast %c32_i32 : i32 to vector<8x128xi32>
    %13 = arith.cmpi slt, %11, %12 : vector<8x128xi32>
    %14 = vector.broadcast %10 : vector<8x1xf32> to vector<8x128xf32>
    %15 = arith.subf %6, %14 : vector<8x128xf32>
    %cst_7 = arith.constant 0.000000e+00 : f32
    %16 = vector.broadcast %cst_7 : f32 to vector<8x128xf32>
    %17 = arith.select %13, %15, %16 : vector<8x128xi1>, vector<8x128xf32>
    %18 = arith.mulf %17, %17 : vector<8x128xf32>
    %cst_8 = arith.constant dense<0.000000e+00> : vector<8xf32>
    %19 = vector.multi_reduction <add>, %18, %cst_8 [1] : vector<8x128xf32> to vector<8xf32>
    %20 = vector.shape_cast %19 : vector<8xf32> to vector<8x1xf32>
    %cst_9 = arith.constant 3.125000e-02 : f32
    %21 = vector.broadcast %cst_9 : f32 to vector<8x1xf32>
    %22 = arith.mulf %20, %21 : vector<8x1xf32>
    %cst_10 = arith.constant 9.99999974E-6 : f32
    %23 = vector.broadcast %cst_10 : f32 to vector<8x1xf32>
    %24 = arith.addf %22, %23 : vector<8x1xf32>
    %25 = math.rsqrt %24 : vector<8x1xf32>
    %26 = vector.broadcast %25 : vector<8x1xf32> to vector<8x128xf32>
    %27 = arith.mulf %17, %26 : vector<8x128xf32>
    %c1 = arith.constant 1 : index
    %c0_11 = arith.constant 0 : index
    %28 = vector.load %arg3[%c1, %c0_11] : memref<8x128xf32, #tpu.memory_space<vmem>>, vector<1x128xf32>
    %29 = vector.broadcast %28 : vector<1x128xf32> to vector<8x128xf32>
    %30 = arith.mulf %27, %29 : vector<8x128xf32>
    %c2 = arith.constant 2 : index
    %c0_12 = arith.constant 0 : index
    %31 = vector.load %arg3[%c2, %c0_12] : memref<8x128xf32, #tpu.memory_space<vmem>>, vector<1x128xf32>
    %32 = vector.broadcast %31 : vector<1x128xf32> to vector<8x128xf32>
    %33 = arith.addf %30, %32 : vector<8x128xf32>
    %34 = math.tanh %33 : vector<8x128xf32>
    %35 = arith.truncf %34 : vector<8x128xf32> to vector<8x128xbf16>
    %c64 = arith.constant 64 : index
    %c0_13 = arith.constant 0 : index
    %36 = vector.load %arg2[%c64, %c0_13] : memref<448x128xbf16, #tpu.memory_space<vmem>>, vector<128x128xbf16>
    %cst_14 = arith.constant dense<0.000000e+00> : vector<8x128xf32>
    %37 = tpu.matmul %35, %36, %cst_14 {dimension_numbers = #tpu.dot_dimension_numbers<[1], [0], [0], [1], [0, 0, 1, 1], [], []>} : vector<8x128xbf16>, vector<128x128xbf16>, vector<8x128xf32> -> vector<8x128xf32>
    %c3 = arith.constant 3 : index
    %c0_15 = arith.constant 0 : index
    %38 = vector.load %arg3[%c3, %c0_15] : memref<8x128xf32, #tpu.memory_space<vmem>>, vector<1x128xf32>
    %39 = vector.broadcast %38 : vector<1x128xf32> to vector<8x128xf32>
    %40 = arith.addf %37, %39 : vector<8x128xf32>
    %cst_16 = arith.constant 0.000000e+00 : f32
    %41 = vector.broadcast %cst_16 : f32 to vector<8x128xf32>
    %42 = arith.maximumf %40, %41 : vector<8x128xf32>
    %43 = arith.truncf %42 : vector<8x128xf32> to vector<8x128xbf16>
    %c192 = arith.constant 192 : index
    %c0_17 = arith.constant 0 : index
    %44 = vector.load %arg2[%c192, %c0_17] : memref<448x128xbf16, #tpu.memory_space<vmem>>, vector<128x128xbf16>
    %cst_18 = arith.constant dense<0.000000e+00> : vector<8x128xf32>
    %45 = tpu.matmul %43, %44, %cst_18 {dimension_numbers = #tpu.dot_dimension_numbers<[1], [0], [0], [1], [0, 0, 1, 1], [], []>} : vector<8x128xbf16>, vector<128x128xbf16>, vector<8x128xf32> -> vector<8x128xf32>
    %c4 = arith.constant 4 : index
    %c0_19 = arith.constant 0 : index
    %46 = vector.load %arg3[%c4, %c0_19] : memref<8x128xf32, #tpu.memory_space<vmem>>, vector<1x128xf32>
    %47 = vector.broadcast %46 : vector<1x128xf32> to vector<8x128xf32>
    %48 = arith.addf %45, %47 : vector<8x128xf32>
    %cst_20 = arith.constant 0.000000e+00 : f32
    %49 = vector.broadcast %cst_20 : f32 to vector<8x128xf32>
    %50 = arith.maximumf %48, %49 : vector<8x128xf32>
    %51 = arith.truncf %50 : vector<8x128xf32> to vector<8x128xbf16>
    %c320 = arith.constant 320 : index
    %c0_21 = arith.constant 0 : index
    %52 = vector.load %arg2[%c320, %c0_21] : memref<448x128xbf16, #tpu.memory_space<vmem>>, vector<128x128xbf16>
    %cst_22 = arith.constant dense<0.000000e+00> : vector<8x128xf32>
    %53 = tpu.matmul %51, %52, %cst_22 {dimension_numbers = #tpu.dot_dimension_numbers<[1], [0], [0], [1], [0, 0, 1, 1], [], []>} : vector<8x128xbf16>, vector<128x128xbf16>, vector<8x128xf32> -> vector<8x128xf32>
    %c5 = arith.constant 5 : index
    %c0_23 = arith.constant 0 : index
    %54 = vector.load %arg3[%c5, %c0_23] : memref<8x128xf32, #tpu.memory_space<vmem>>, vector<1x128xf32>
    %55 = vector.broadcast %54 : vector<1x128xf32> to vector<8x128xf32>
    %56 = arith.addf %53, %55 : vector<8x128xf32>
    %57 = tpu.iota {dimensions = array<i32: 1>} : vector<8x128xi32>
    %c6_i32 = arith.constant 6 : i32
    %58 = vector.broadcast %c6_i32 : i32 to vector<8x128xi32>
    %59 = arith.cmpi slt, %57, %58 : vector<8x128xi32>
    %cst_24 = arith.constant 2.000000e+00 : f32
    %60 = vector.broadcast %cst_24 : f32 to vector<8x128xf32>
    %61 = arith.mulf %60, %56 : vector<8x128xf32>
    %62 = arith.select %59, %61, %56 : vector<8x128xi1>, vector<8x128xf32>
    %63 = arith.negf %62 : vector<8x128xf32>
    %64 = math.exp %63 : vector<8x128xf32>
    %cst_25 = arith.constant 1.000000e+00 : f32
    %65 = vector.broadcast %cst_25 : f32 to vector<8x128xf32>
    %66 = arith.addf %65, %64 : vector<8x128xf32>
    %67 = arith.divf %65, %66 : vector<8x128xf32>
    %cst_26 = arith.constant 2.000000e+00 : f32
    %68 = vector.broadcast %cst_26 : f32 to vector<8x128xf32>
    %69 = arith.mulf %68, %67 : vector<8x128xf32>
    %cst_27 = arith.constant 1.000000e+00 : f32
    %70 = vector.broadcast %cst_27 : f32 to vector<8x128xf32>
    %71 = arith.subf %69, %70 : vector<8x128xf32>
    %cst_28 = arith.constant 1.000000e-01 : f32
    %72 = vector.broadcast %cst_28 : f32 to vector<8x128xf32>
    %73 = arith.addf %67, %72 : vector<8x128xf32>
    %74 = arith.select %59, %71, %73 : vector<8x128xi1>, vector<8x128xf32>
    %75 = vector.extract_strided_slice %74 {offsets = [0, 0], sizes = [8, 12], strides = [1, 1]} : vector<8x128xf32> to vector<8x12xf32>
    %c0_29 = arith.constant 0 : index
    %c0_30 = arith.constant 0 : index
    %76 = vector.load %arg4[%c0_29, %c0_30] : memref<8x12xf32, #tpu.memory_space<vmem>>, vector<8x12xf32>
    tpu.vector_store %arg4[%c0_29, %c0_30], %75 {strides = array<i32>} : memref<8x12xf32, #tpu.memory_space<vmem>>, vector<8x12xf32>,
    return
  }
  func.func @transform_0(%arg0: i32) -> (i32, i32) {
    %c0_i32 = arith.constant 0 : i32
    %c0_i32_0 = arith.constant 0 : i32
    return %arg0, %c0_i32 : i32, i32
  }
  func.func @transform_1(%arg0: i32) -> (i32, i32) {
    %c0_i32 = arith.constant 0 : i32
    %c0_i32_0 = arith.constant 0 : i32
    %c0_i32_1 = arith.constant 0 : i32
    return %c0_i32, %c0_i32_0 : i32, i32
  }
  func.func @transform_2(%arg0: i32) -> (i32, i32) {
    %c0_i32 = arith.constant 0 : i32
    %c0_i32_0 = arith.constant 0 : i32
    %c0_i32_1 = arith.constant 0 : i32
    return %c0_i32, %c0_i32_0 : i32, i32
  }
  func.func @transform_3(%arg0: i32) -> (i32, i32) {
    %c0_i32 = arith.constant 0 : i32
    %c0_i32_0 = arith.constant 0 : i32
    return %arg0, %c0_i32 : i32, i32
  }
}

</mosaic_0001>

<bundles_post_ra>
// kernel: actor_forward.1
= control target key start
LH: loop header
LB: loop body
LE: loop exit
PB: predicated region body
PF: predicated region fallthrough
CT: control target
= control target key end

     0   :  { %8 = vsyncpa [#allocation3], 0  ;;  %s876_s0 = inlined_call_operand.hbm [shape: f32[8,64], index: 0, kind: input, shape index: {}]   ;;  %s877_s1 = inlined_call_operand.hbm [shape: bf16[448,128], index: 1, kind: input, shape index: {}]   ;;  %s878_s2 = inlined_call_operand.hbm [shape: f32[8,128], index: 2, kind: input, shape index: {}]   ;;  %s879_s3 = inlined_call_operand.vmem [shape: f32[8,12], index: 3, kind: output, shape index: {}]  }
   0x1   :  { %9 = vsyncpa [#allocation5], 0  ;;  %s770_s12 = smov [#allocation4]   ;;  %s700_s16 = scalar_lea.hbm %s877_s1, 3584 }
   0x2   :  { %s25_s13 = sshll.u32 %s770_s12, 4  ;;  %p701_p0 = scmp.ne.s32.totalorder %s877_s1, %s700_s16  ;;  %s26_s13 = int_to_ptr.vmem [resolvable:$true] %s25_s13 }
   0x3   :  { %p704_p1 = scmp.lt.u32.totalorder %s700_s16, %s877_s1 }
   0x5   :  { %p706_p2 = pnand %p704_p1, %p701_p0 }
   0x7   :  { %709 = shalt.err (!%p706_p2)
}
   0x8   :  { %s710_s21 = scalar_lea.vmem %s26_s13, 3584  ;;  %p715_p4 = scmp.lt.s32.totalorder %s26_s13, %s26_s13 }
   0x9   :  { %p711_p3 = scmp.ne.s32.totalorder %s26_s13, %s710_s21  ;;  %p716_p5 = scmp.lt.s32.totalorder %s710_s21, %s710_s21 }
   0xb   :  { %p717_p6 = por %p716_p5, %p715_p4 }
   0xd   :  { %p718_p7 = pnand %p717_p6, %p711_p3 }
   0xf   :  { %721 = shalt.err (!%p718_p7)
}
  0x10   :  { %s771_s22 = smov 64   ;;  %s772_s23 = smov 4  }
  0x11   :  { %31 = dma.hbm_to_vmem [thread:$0]  %s877_s1, 3584, %s26_s13, [#allocation5], %s771_s22, %s771_s22, %s772_s23  }
  0x12   :  { %s773_s26 = smov [#allocation2]   ;;  %s774_s28 = smov [#allocation6]  }
  0x13   :  { %s16_s27 = sshll.u32 %s773_s26, 4  ;;  %s38_s29 = sshll.u32 %s774_s28, 4  ;;  %s17_s27 = int_to_ptr.vmem [resolvable:$true] %s16_s27  ;;  %s39_s29 = int_to_ptr.vmem [resolvable:$true] %s38_s29 }
  0x14   :  { %s722_s5 = scalar_lea.hbm %s876_s0, 128 }
  0x15   :  { %p723_p8 = scmp.ne.s32.totalorder %s876_s0, %s722_s5  ;;  %p726_p9 = scmp.lt.u32.totalorder %s722_s5, %s876_s0 }
  0x17   :  { %p728_p10 = pnand %p726_p9, %p723_p8 }
  0x19   :  { %731 = shalt.err (!%p728_p10)
}
  0x1a   :  { %s732_s1 = scalar_lea.vmem %s17_s27, 128  ;;  %p737_p12 = scmp.lt.s32.totalorder %s17_s27, %s17_s27 }
  0x1b   :  { %p733_p11 = scmp.ne.s32.totalorder %s17_s27, %s732_s1  ;;  %p738_p13 = scmp.lt.s32.totalorder %s732_s1, %s732_s1 }
  0x1d   :  { %p739_p0 = por %p738_p13, %p737_p12 }
  0x1f   :  { %p740_p1 = pnand %p739_p0, %p733_p11 }
  0x21   :  { %743 = shalt.err (!%p740_p1)
}
  0x22   :  { %19 = dma.hbm_to_vmem [thread:$0]  %s876_s0, 128, %s17_s27, [#allocation3]  }
  0x23   :  { %s744_s14 = scalar_lea.hbm %s878_s2, 128 }
  0x24   :  { %p745_p2 = scmp.ne.s32.totalorder %s878_s2, %s744_s14  ;;  %p748_p3 = scmp.lt.u32.totalorder %s744_s14, %s878_s2 }
  0x26   :  { %p750_p4 = pnand %p748_p3, %p745_p2 }
  0x28   :  { %753 = shalt.err (!%p750_p4)
}
  0x29   :  { %s754_s19 = scalar_lea.vmem %s39_s29, 128  ;;  %p759_p6 = scmp.lt.s32.totalorder %s39_s29, %s39_s29 }
  0x2a   :  { %p755_p5 = scmp.ne.s32.totalorder %s39_s29, %s754_s19  ;;  %p760_p7 = scmp.lt.s32.totalorder %s754_s19, %s754_s19 }
  0x2c   :  { %p761_p8 = por %p760_p7, %p759_p6 }
  0x2e   :  { %p762_p9 = pnand %p761_p8, %p755_p5 }
  0x30   :  { %765 = shalt.err (!%p762_p9)
}
  0x31   :  { %41 = dma.hbm_to_vmem [thread:$0]  %s878_s2, 128, %s39_s29, [#allocation5]  }
  0x32   :  { %766 = dma.done.wait [#allocation3], 128  }
  0x33   :  { %767 = vsyncadd [#allocation3], 4294967168 }
  0x34   :  { %768 = dma.done.wait [#allocation5], 3712  }
  0x35   :  { %769 = vsyncadd [#allocation5], 4294963584  ;;  %v775_v0 = vmov 0.0   ;;  %vm776_vm0 = vmmov 0   ;;  %v664_v1 = vld [vmem:[#allocation4] sm:$0xff]   ;;  %v665_v2 = vld [vmem:[#allocation4 + $0x8] sm:$0xff]   ;;  %v138_v13 = vlaneseq }
  0x36   :  { %585 = vmatprep.subr.bf16.mxu0 %v775_v0  ;;  %593 = vmatprep.mubr.msk.bf16.mxu0 %vm776_vm0, %v775_v0  ;;  %v666_v3 = vld [vmem:[#allocation4 + $0x10] sm:$0xff]   ;;  %vm91_vm1 = vcmask 523264   ;;  %v667_v4 = vld [vmem:[#allocation4 + $0x18] sm:$0xff]   ;;  %v516_v7 = vld [vmem:[#allocation6] ss:$0 sm:$0xff]  ;;  %vm508_vm4 = vcmask 97280  }
  0x37   :  { %597 = vmatprep.subr.bf16.mxu1 %v775_v0  ;;  %613 = vmatprep.mubr.msk.bf16.mxu1 %vm776_vm0, %v775_v0  ;;  %v52_v5 = vld [vmem:[#allocation2] sm:$0xff]  ;;  %v845_v14 = vand.u32 127, %v138_v13  ;;  %v668_v20 = vld [vmem:[#allocation4 + $0x20] sm:$0xff]   ;;  %v669_v21 = vld [vmem:[#allocation4 + $0x28] sm:$0xff]  }
  0x38   :  { %586 = vmatpush3.bf16.msra.mxu0 %v664_v1  ;;  %v53_v6 = vpack.c.bf16 %v52_v5, %v52_v5  ;;  %598 = vmatpush3.bf16.msra.mxu1 %v668_v20  ;;  %v670_v22 = vld [vmem:[#allocation4 + $0x30] sm:$0xff]   ;;  %v671_v23 = vld [vmem:[#allocation4 + $0x38] sm:$0xff]   ;;  %v672_v24 = vld [vmem:[#allocation4 + $0x40] sm:$0xff]  }
  0x39   :  { %587 = vmatprep.subr.bf16.mxu0 %v775_v0  ;;  %vm140_vm2 = vcmp.lt.s32.totalorder %v845_v14, 32  ;;  %599 = vmatprep.subr.bf16.mxu1 %v775_v0  ;;  %v673_v25 = vld [vmem:[#allocation4 + $0x48] sm:$0xff]   ;;  %v674_v26 = vld [vmem:[#allocation4 + $0x50] sm:$0xff]   ;;  %v675_v27 = vld [vmem:[#allocation4 + $0x58] sm:$0xff]   ;;  %vm495_vm3 = vcmp.lt.s32.totalorder %v845_v14, 6 }
  0x3a   :  { %v676_v28 = vld [vmem:[#allocation4 + $0x60] sm:$0xff]   ;;  %v677_v29 = vld [vmem:[#allocation4 + $0x68] sm:$0xff]   ;;  %v678_v30 = vld [vmem:[#allocation4 + $0x70] sm:$0xff]  }
  0x3b   :  { %v679_v31 = vld [vmem:[#allocation4 + $0x78] sm:$0xff]   ;;  %v680_v32 = vld [vmem:[#allocation4 + $0x80] sm:$0xff]   ;;  %v681_v33 = vld [vmem:[#allocation4 + $0x88] sm:$0xff]  }
  0x3c   :  { %588 = vmatpush3.bf16.msra.mxu0 %v665_v2  ;;  %600 = vmatpush3.bf16.msra.mxu1 %v669_v21  ;;  %v522_v38 = vld [vmem:[#allocation6 + $0x1] ss:$0 sm:$0xff]  ;;  %v523_v40 = vld [vmem:[#allocation6 + $0x2] ss:$0 sm:$0xff]  ;;  %v682_v45 = vld [vmem:[#allocation4 + $0x90] sm:$0xff]  }
  0x3d   :  { %589 = vmatprep.subr.bf16.mxu0 %v775_v0  ;;  %601 = vmatprep.subr.bf16.mxu1 %v775_v0  ;;  %v683_v46 = vld [vmem:[#allocation4 + $0x98] sm:$0xff]   ;;  %v684_v47 = vld [vmem:[#allocation4 + $0xa0] sm:$0xff]   ;;  %v685_v48 = vld [vmem:[#allocation4 + $0xa8] sm:$0xff]  }
  0x3e   :  { %v686_v49 = vld [vmem:[#allocation4 + $0xb0] sm:$0xff]   ;;  %v687_v50 = vld [vmem:[#allocation4 + $0xb8] sm:$0xff]   ;;  %v688_v51 = vld [vmem:[#allocation4 + $0xc0] sm:$0xff]  }
  0x3f   :  { %v689_v52 = vld [vmem:[#allocation4 + $0xc8] sm:$0xff]   ;;  %v524_v53 = vld [vmem:[#allocation6 + $0x3] ss:$0 sm:$0xff]  ;;  %v690_v61 = vld [vmem:[#allocation4 + $0xd0] sm:$0xff]  }
  0x40   :  { %590 = vmatpush3.bf16.msra.mxu0 %v666_v3  ;;  %602 = vmatpush3.bf16.msra.mxu1 %v670_v22  ;;  %v691_v62 = vld [vmem:[#allocation4 + $0xd8] sm:$0xff]   ;;  %v533_v63 = vld [vmem:[#allocation6 + $0x4] ss:$0 sm:$0xff] }
  0x41   :  { %591 = vmatprep.subr.bf16.mxu0 %v775_v0  ;;  %603 = vmatprep.subr.bf16.mxu1 %v775_v0 }
  0x44   :  { %592 = vmatpush3.bf16.msra.mxu0 %v667_v4  ;;  %604 = vmatpush3.bf16.msra.mxu1 %v671_v23 }
  0x45   :  { %617 = vmatprep.subr.bf16.mxu0 %v775_v0  ;;  %605 = vmatprep.subr.bf16.mxu1 %v775_v0 }
  0x47   :  { %594 = vmatmul.mubr.msk.bf16.vlgmr.msra.gmra.mrb[0].mxu0 %vm91_vm1, %v53_v6 }
  0x48   :  { %633 = vmatprep.mubr.msk.bf16.mxu0 %vm776_vm0, %v775_v0  ;;  %606 = vmatpush3.bf16.msra.mxu1 %v672_v24 }
  0x49   :  { %607 = vmatprep.subr.bf16.mxu1 %v775_v0  ;;  %618 = vmatpush3.bf16.msra.mxu0 %v676_v28 }
  0x4a   :  { %619 = vmatprep.subr.bf16.mxu0 %v775_v0 }
  0x4c   :  { %608 = vmatpush3.bf16.msra.mxu1 %v673_v25 }
  0x4d   :  { %609 = vmatprep.subr.bf16.mxu1 %v775_v0  ;;  %620 = vmatpush3.bf16.msra.mxu0 %v677_v29 }
  0x4e   :  { %621 = vmatprep.subr.bf16.mxu0 %v775_v0 }
  0x50   :  { %610 = vmatpush3.bf16.msra.mxu1 %v674_v26 }
  0x51   :  { %611 = vmatprep.subr.bf16.mxu1 %v775_v0  ;;  %622 = vmatpush3.bf16.msra.mxu0 %v678_v30 }
  0x52   :  { %623 = vmatprep.subr.bf16.mxu0 %v775_v0 }
  0x54   :  { %612 = vmatpush3.bf16.msra.mxu1 %v675_v27 }
  0x55   :  { %637 = vmatprep.subr.bf16.mxu1 %v775_v0  ;;  %624 = vmatpush3.bf16.msra.mxu0 %v679_v31 }
  0x56   :  { %625 = vmatprep.subr.bf16.mxu0 %v775_v0 }
  0x59   :  { %626 = vmatpush3.bf16.msra.mxu0 %v680_v32 }
  0x5a   :  { %627 = vmatprep.subr.bf16.mxu0 %v775_v0 }
  0x5d   :  { %628 = vmatpush3.bf16.msra.mxu0 %v681_v33 }
  0x5e   :  { %629 = vmatprep.subr.bf16.mxu0 %v775_v0 }
  0x61   :  { %630 = vmatpush3.bf16.msra.mxu0 %v682_v45 }
  0x62   :  { %631 = vmatprep.subr.bf16.mxu0 %v775_v0 }
  0x65   :  { %632 = vmatpush3.bf16.msra.mxu0 %v683_v46 }
 0x11a   :  { %v129_v8 = vpop.f32.mrb[0].mxu0 }
 0x11b   :  { %v130_v9 = vadd.f32 %v516_v7, %v129_v8  ;;  %v595_v10 = vpop.f32.mrb[1].mxu0  ;;  %v542_v8 = vld [vmem:[#allocation6 + $0x5] ss:$0 sm:$0xff] }
 0x11c   :  { %v132_v11 = vpop.f32.mrb[2].mxu0 }
 0x11d   :  { %135 = vadd.xlane.f32.xlu0 %v130_v9  ;;  %v596_v12 = vpop.f32.mrb[3].mxu0 }
 0x1aa   :  { %v136_v15 = vpop.xlane.xlu0 %135 }
 0x1ab   :  { %v137_v16 = vmul.f32 0.03125, %v136_v15 }
 0x1ad   :  { %v141_v17 = vsub.f32 %v130_v9, %v137_v16 }
 0x1af   :  { %v142_v18 = vsel %vm140_vm2, %v141_v17, 0.0 }
 0x1b0   :  { %v143_v19 = vmul.f32 %v142_v18, %v142_v18 }
 0x1b2   :  { %144 = vadd.xlane.f32.xlu0 %v143_v19 }
 0x23f   :  { %v145_v34 = vpop.xlane.xlu0 %144 }
 0x240   :  { %v146_v35 = vmul.f32 0.03125, %v145_v34 }
 0x242   :  { %v147_v36 = vadd.f32 1e-05, %v146_v35 }
 0x244   :  { %692 = vrsqrt.f32 %v147_v36 }
 0x24e   :  { %v693_v37 = vpop.eup %692 }
 0x24f   :  { %v149_v39 = vmul.f32 %v693_v37, %v142_v18 }
 0x251   :  { %v155_v41 = vmul.f32 %v522_v38, %v149_v39 }
 0x253   :  { %v161_v42 = vadd.f32 %v523_v40, %v155_v41 }
 0x255   :  { %694 = vtanh.f32 %v161_v42 }
 0x25f   :  { %v695_v43 = vpop.eup %694 }
 0x260   :  { %v163_v44 = vpack.c.bf16 %v695_v43, %v695_v43 }
 0x262   :  { %614 = vmatmul.mubr.bf16.vlgmr.msra.gmra.mrb[0].mxu1 %v163_v44 }
 0x263   :  { %653 = vmatprep.mubr.msk.bf16.mxu1 %vm776_vm0, %v775_v0  ;;  %638 = vmatpush3.bf16.msra.mxu1 %v684_v47 }
 0x264   :  { %639 = vmatprep.subr.bf16.mxu1 %v775_v0 }
 0x267   :  { %640 = vmatpush3.bf16.msra.mxu1 %v685_v48 }
 0x268   :  { %641 = vmatprep.subr.bf16.mxu1 %v775_v0 }
 0x26b   :  { %642 = vmatpush3.bf16.msra.mxu1 %v686_v49 }
 0x26c   :  { %643 = vmatprep.subr.bf16.mxu1 %v775_v0 }
 0x26f   :  { %644 = vmatpush3.bf16.msra.mxu1 %v687_v50 }
 0x270   :  { %645 = vmatprep.subr.bf16.mxu1 %v775_v0 }
 0x273   :  { %646 = vmatpush3.bf16.msra.mxu1 %v688_v51 }
 0x274   :  { %647 = vmatprep.subr.bf16.mxu1 %v775_v0 }
 0x277   :  { %648 = vmatpush3.bf16.msra.mxu1 %v689_v52 }
 0x278   :  { %649 = vmatprep.subr.bf16.mxu1 %v775_v0 }
 0x27b   :  { %650 = vmatpush3.bf16.msra.mxu1 %v690_v61 }
 0x27c   :  { %651 = vmatprep.subr.bf16.mxu1 %v775_v0 }
 0x27f   :  { %652 = vmatpush3.bf16.msra.mxu1 %v691_v62 }
 0x335   :  { %v267_v54 = vpop.f32.mrb[0].mxu1 }
 0x336   :  { %v268_v55 = vadd.f32 %v524_v53, %v267_v54  ;;  %v615_v56 = vpop.f32.mrb[1].mxu1 }
 0x337   :  { %v270_v57 = vpop.f32.mrb[2].mxu1 }
 0x338   :  { %v273_v58 = vmax.f32 %v268_v55, 0.0  ;;  %v616_v59 = vpop.f32.mrb[3].mxu1 }
 0x33a   :  { %v274_v60 = vpack.c.bf16 %v273_v58, %v273_v58 }
 0x33c   :  { %634 = vmatmul.mubr.bf16.vlgmr.msra.gmra.mrb[4].mxu0 %v274_v60 }
 0x40f   :  { %v378_v1 = vpop.f32.mrb[4].mxu0 }
 0x410   :  { %v379_v2 = vadd.f32 %v533_v63, %v378_v1  ;;  %v635_v3 = vpop.f32.mrb[5].mxu0 }
 0x411   :  { %v381_v4 = vpop.f32.mrb[6].mxu0 }
 0x412   :  { %v384_v5 = vmax.f32 %v379_v2, 0.0  ;;  %v636_v6 = vpop.f32.mrb[7].mxu0 }
 0x414   :  { %v385_v7 = vpack.c.bf16 %v384_v5, %v384_v5 }
 0x416   :  { %654 = vmatmul.mubr.bf16.vlgmr.msra.gmra.mrb[4].mxu1 %v385_v7 }
 0x4e9   :  { %v489_v9 = vpop.f32.mrb[4].mxu1 }
 0x4ea   :  { %v490_v10 = vadd.f32 %v542_v8, %v489_v9  ;;  %v655_v11 = vpop.f32.mrb[5].mxu1 }
 0x4eb   :  { %v492_v12 = vpop.f32.mrb[6].mxu1 }
 0x4ec   :  { %v496_v13 = vmul.f32 2.0, %v490_v10  ;;  %v656_v0 = vpop.f32.mrb[7].mxu1 }
 0x4ee   :  { %v497_v15 = vsel %vm495_vm3, %v496_v13, %v490_v10 }
 0x4ef   :  { %v551_v16 = vmul.f32 -1.442695, %v497_v15 }
 0x4f1   :  { %696 = vpow2.f32 %v551_v16 }
 0x4fb   :  { %v697_v17 = vpop.eup %696 }
 0x4fc   :  { %v501_v18 = vadd.f32 1.0, %v697_v17 }
 0x4fe   :  { %698 = vrcp.f32 %v501_v18 }
 0x508   :  { %v699_v19 = vpop.eup %698 }
 0x509   :  { %v504_v20 = vmul.f32 2.0, %v699_v19  ;;  %v506_v22 = vadd.f32 0.1, %v699_v19 }
 0x50b   :  { %v552_v21 = vadd.f32 -1.0, %v504_v20 }
 0x50d   :  { %v507_v23 = vsel %vm495_vm3, %v552_v21, %v506_v22 }
 0x50e   :  { %509 = vst.msk [vmem:[%s879_s3] sm:$0xff] %vm508_vm4, %v507_v23 }
 0x50f   :  { %514 = vsyncpa [#allocation3], 1 }
 0x510   :  { %515 = vsyncpa [#allocation5], 1 }

</bundles_post_ra>
